<compile_context>
chip_gen: v7x
topology: tpu7x:2x2x1
jax: 0.10.0
libtpu: 0.0.40
codegen_flags: <defaults>
</compile_context>

<pallas_src>
import jax
import jax.numpy as jnp
from jax.experimental import pallas as pl
from jax.experimental.pallas import tpu as pltpu

_LANE = 128
_SUBLANE_BF16 = 16  # dtype-aware row rounding for bf16 blocks


def _activation_fn(name):
    if name == "relu":
        return lambda h: jnp.maximum(h, 0.0)
    if name == "tanh":
        return jnp.tanh
    if name == "linear":
        return lambda h: h
    raise NotImplementedError("Other activations have not been implemented!")


def _round_up(n, m):
    return ((n + m - 1) // m) * m


def _pad_to(a, shape):
    pads = [(0, t - s) for s, t in zip(a.shape, shape)]
    if all(p == (0, 0) for p in pads):
        return a
    return jnp.pad(a, pads)


def prepare_params(weights, compute_dtype=jnp.bfloat16):
    """Pad/cast the bias-free linear weights ONCE (hoisted out of forward).

    weights: list of (in_features, out_features) arrays (torch weight
    transposed; kernels compute h @ W).
    """
    num_hidden = len(weights) - 1
    if num_hidden < 1:
        raise NotImplementedError("LinearNetwork requires >= 1 hidden layer")
    input_size = int(weights[0].shape[0])
    out_size = int(weights[-1].shape[1])
    hidden_sizes = [int(w.shape[1]) for w in weights[:-1]]

    h_pad = max(_round_up(h, _LANE) for h in hidden_sizes)
    out_pad = _round_up(out_size, _LANE)
    # K tiling for layer 0 (keeps stage-1 usable for large input_size).
    tk = min(512, _round_up(input_size, _LANE))
    d_pad = _round_up(input_size, tk)

    w0 = _pad_to(weights[0].astype(compute_dtype), (d_pad, h_pad))
    w_tail = [_pad_to(w.astype(compute_dtype), (h_pad, h_pad))
              for w in weights[1:-1]]
    w_tail.append(_pad_to(weights[-1].astype(compute_dtype), (h_pad, out_pad)))
    # TODO(synk): for very wide hidden layers on v7x (64 MiB VMEM), add a
    # K-tiling grid axis / pl.Buffered(1) for the tail weights as well.

    return dict(w0=w0, w_tail=tuple(w_tail), num_hidden=num_hidden,
                input_size=input_size, out_size=out_size,
                d_pad=d_pad, tk=tk, h_pad=h_pad, out_pad=out_pad,
                compute_dtype=compute_dtype)


def _make_layer0_kernel(activation):
    """h0 = act(x @ W0) for the B unique rows, K-tiled with f32 accumulator."""
    act = _activation_fn(activation)

    def kernel(x_ref, w_ref, o_ref, acc_ref):
        @pl.when(pl.program_id(0) == 0)
        def _init():
            acc_ref[...] = jnp.zeros_like(acc_ref)

        acc_ref[...] += jnp.dot(x_ref[...], w_ref[...],
                                preferred_element_type=jnp.float32)

        @pl.when(pl.program_id(0) == pl.num_programs(0) - 1)
        def _fin():
            o_ref[...] = act(acc_ref[...])

    return kernel


def _make_tail_kernel(num_hidden, activation, task, out_valid, ts, h_pad,
                      compute_dtype, with_dropout):
    """Per-sample dropout + hidden layers 1..N-1 + output layer + head."""
    act = _activation_fn(activation)

    def kernel(*refs):
        if with_dropout:
            h0_ref, mask_ref = refs[0], refs[1]
            w_refs = refs[2:2 + num_hidden]
        else:
            h0_ref = refs[0]
            w_refs = refs[1:1 + num_hidden]
        o_ref = refs[-1]

        b = pl.program_id(0)
        # Sample-invariant layer-0 activation of batch row b, broadcast across
        # the ts MC samples of this tile (no HBM replication of x or h0).
        h = jnp.broadcast_to(h0_ref[pl.ds(b, 1), :], (ts, h_pad))

        if with_dropout:
            h = h * mask_ref[:, 0:h_pad]

        for j in range(1, num_hidden):
            h = jnp.dot(h.astype(compute_dtype), w_refs[j - 1][...],
                        preferred_element_type=jnp.float32)
            h = act(h)
            if with_dropout:
                h = h * mask_ref[:, j * h_pad:(j + 1) * h_pad]

        logits = jnp.dot(h.astype(compute_dtype), w_refs[num_hidden - 1][...],
                         preferred_element_type=jnp.float32)

        if task == "binary_classification":
            out = 1.0 / (1.0 + jnp.exp(-logits))          # exact sigmoid
        elif task == "classification":
            if out_valid < logits.shape[-1]:
                col = jax.lax.broadcasted_iota(jnp.int32, logits.shape, 1)
                logits = jnp.where(col < out_valid, logits, -1e30)
            m = jnp.max(logits, axis=-1, keepdims=True)
            e = jnp.exp(logits - m)
            out = e / jnp.sum(e, axis=-1, keepdims=True)  # exact division
        else:
            out = logits
        o_ref[...] = out.astype(o_ref.dtype)

    return kernel


def linear_network_forward(x, params, *, p=0.0, num_samples=1, seed=0,
                           activation="relu", task="classification",
                           tile_samples=256):
    """Fused Pallas forward of LinearNetwork with num_samples MC-dropout passes.

    Returns (probs, aux): probs is (B, out) for num_samples == 1 and
    (num_samples, B, out) otherwise; aux mirrors torch.tensor([0.0]).view(1).
    """
    compute_dtype = params["compute_dtype"]
    num_hidden = params["num_hidden"]
    input_size = params["input_size"]
    out_size = params["out_size"]
    d_pad, tk = params["d_pad"], params["tk"]
    h_pad, out_pad = params["h_pad"], params["out_pad"]

    x2d = x.reshape(-1, input_size)           # torch .view(-1, input_size)
    B = int(x2d.shape[0])

    # ---------- Stage 1: sample-invariant prefix h0 = act(x @ W0), B rows.
    b_pad = _round_up(B, _SUBLANE_BF16)
    x_pad = _pad_to(x2d.astype(compute_dtype), (b_pad, d_pad))
    n_k = d_pad // tk

    h0 = pl.pallas_call(
        _make_layer0_kernel(activation),
        out_shape=jax.ShapeDtypeStruct((b_pad, h_pad), jnp.float32),
        grid=(n_k,),
        in_specs=[pl.BlockSpec((b_pad, tk), lambda k: (0, k)),
                  pl.BlockSpec((tk, h_pad), lambda k: (k, 0))],
        out_specs=pl.BlockSpec((b_pad, h_pad), lambda k: (0, 0)),
        scratch_shapes=[pltpu.VMEM((b_pad, h_pad), jnp.float32)],
        compiler_params=pltpu.CompilerParams(
            dimension_semantics=("arbitrary",),
            vmem_limit_bytes=32 * 1024 * 1024),
    )(x_pad, params["w0"])

    # ---------- Stage 2: dropout + remaining layers + head, (batch, sample) grid.
    ts = _round_up(min(tile_samples, _round_up(num_samples, _SUBLANE_BF16)),
                   _SUBLANE_BF16)
    s_pad = _round_up(num_samples, ts)
    n_s = s_pad // ts
    rows = B * s_pad                          # batch-major: row = b*s_pad + s

    apply_dropout = p > 0.0
    keep_prob = 1.0 - float(p)
    kernel = _make_tail_kernel(num_hidden, activation, task, out_size, ts,
                               h_pad, compute_dtype, apply_dropout)

    inputs = [h0]
    in_specs = [pl.BlockSpec((b_pad, h_pad), lambda b, s: (0, 0))]
    if apply_dropout:
        # Standard Bernoulli MC-dropout masks (value 0 or 1/keep_prob).
        # TODO(synk): only the standard dropout from DROPOUT_FACTORY is
        # replicated (Gaussian/other variants are not).
        keep = jax.random.bernoulli(jax.random.PRNGKey(seed), keep_prob,
                                    (rows, num_hidden * h_pad))
        masks = keep.astype(jnp.float32) * (1.0 / keep_prob)
        inputs.append(masks)
        in_specs.append(pl.BlockSpec((ts, num_hidden * h_pad),
                                     lambda b, s: (b * n_s + s, 0)))
    inputs.extend(params["w_tail"])
    in_specs.extend([pl.BlockSpec(w.shape, lambda b, s: (0, 0))
                     for w in params["w_tail"]])

    out = pl.pallas_call(
        kernel,
        out_shape=jax.ShapeDtypeStruct((rows, out_pad), jnp.float32),
        grid=(B, n_s),
        in_specs=in_specs,
        out_specs=pl.BlockSpec((ts, out_pad), lambda b, s: (b * n_s + s, 0)),
        compiler_params=pltpu.CompilerParams(
            dimension_semantics=("parallel", "parallel"),
            vmem_limit_bytes=32 * 1024 * 1024),
    )(*inputs)

    probs = out.reshape(B, s_pad, out_pad)[:, :num_samples, :out_size]
    probs = jnp.transpose(probs, (1, 0, 2))   # (num_samples, B, out)
    if num_samples == 1:
        probs = probs[0]

    aux = jnp.zeros((1,), dtype=jnp.float32)  # torch.tensor([0.0]).view(1)
    return probs, aux


def _reference_forward(x, weights, activation, task,
                       compute_dtype=jnp.bfloat16):
    """Pure-JAX reference mirroring the kernel's bf16-in / f32-acc dtypes."""
    act = _activation_fn(activation)
    h = x.reshape(-1, weights[0].shape[0]).astype(compute_dtype)
    for w in weights[:-1]:
        h = act(jnp.dot(h, w.astype(compute_dtype),
                        preferred_element_type=jnp.float32))
        h = h.astype(compute_dtype)
    logits = jnp.dot(h, weights[-1].astype(compute_dtype),
                     preferred_element_type=jnp.float32)
    if task == "binary_classification":
        return jax.nn.sigmoid(logits)
    if task == "classification":
        return jax.nn.softmax(logits, axis=-1)
    return logits


if __name__ == "__main__":
    # Module config: input_size = (4,16,16) -> 1024, layers = [32, 32],
    # output_size = 8, relu, p = 0.1, softmax head.
    B = 2
    in_shape = (4, 16, 16)
    layers = [32, 32]
    output_size = 8
    p = 0.1
    activation = "relu"
    task = "classification"

    input_size = 1
    for d in in_shape:
        input_size *= d

    key = jax.random.PRNGKey(0)
    kx, kw = jax.random.split(key)
    x = jax.random.normal(kx, (B, *in_shape), dtype=jnp.float32)

    dims = [input_size] + [int(l) for l in layers] + [output_size]
    wkeys = jax.random.split(kw, len(dims) - 1)
    weights = [
        (jax.random.normal(wkeys[i], (dims[i], dims[i + 1]), dtype=jnp.float32)
         * (1.0 / jnp.sqrt(dims[i])))
        for i in range(len(dims) - 1)
    ]

    params = prepare_params(weights)          # pad/cast weights once, reuse
    ref = _reference_forward(x, weights, activation, task)

    # 1) Deterministic check (dropout off): 192 fused MC samples; every sample
    #    must equal the reference (layer 0 computed once, broadcast in-kernel).
    det, aux = linear_network_forward(x, params, p=0.0, num_samples=192,
                                      activation=activation, task=task)
    det = jax.block_until_ready(det)
    aux = jax.block_until_ready(aux)
    assert det.shape == (192, B, output_size)
    assert aux.shape == (1,)
    max_err = jnp.max(jnp.abs(det - ref[None]))
    assert jnp.allclose(det, ref[None], rtol=1e-2, atol=2e-3), (
        f"max abs err {max_err}")
    assert jnp.allclose(jnp.sum(det, axis=-1), 1.0, atol=5e-3)

    # Single-sample path.
    one, _ = linear_network_forward(x, params, p=0.0, num_samples=1,
                                    activation=activation, task=task)
    one = jax.block_until_ready(one)
    assert one.shape == (B, output_size)
    assert jnp.allclose(one, ref, rtol=1e-2, atol=2e-3)

    # 2) MC-dropout: 256 stochastic samples fused into one call.
    mc, _ = linear_network_forward(x, params, p=p, num_samples=256, seed=1234,
                                   activation=activation, task=task)
    mc = jax.block_until_ready(mc)
    assert mc.shape == (256, B, output_size)
    assert bool(jnp.all(jnp.isfinite(mc)))
    assert jnp.allclose(jnp.sum(mc, axis=-1), 1.0, atol=5e-3)
    spread = jnp.mean(jnp.std(mc, axis=0))
    assert spread > 1e-5, f"dropout appears inactive, spread={spread}"
    assert jnp.max(jnp.abs(jnp.mean(mc, axis=0) - ref)) < 0.3

    print("KERNEL_OK")
</pallas_src>

<mosaic_0001>
module attributes {stable_mosaic.version = 11 : i64} {
  func.func @kernel(%arg0: i32, %arg1: memref<16x512xbf16, #tpu.memory_space<vmem>>, %arg2: memref<512x128xbf16, #tpu.memory_space<vmem>>, %arg3: memref<16x128xf32, #tpu.memory_space<vmem>>, %arg4: memref<16x128xf32, #tpu.memory_space<vmem>>) attributes {dimension_semantics = [#tpu.dimension_semantics<arbitrary>], iteration_bounds = array<i64: 2>, scalar_prefetch = 0 : i64, scratch_operands = 1 : i64, tpu.core_type = #tpu.core_type<tc>, window_params = [{transform_indices = @transform_0, window_bounds = array<i64: 16, 512>}, {transform_indices = @transform_1, window_bounds = array<i64: 512, 128>}, {pipeline_mode = #tpu.pipeline_mode<synchronous>, transform_indices = @transform_2, window_bounds = array<i64: 16, 128>}]} {
    %c0_i32 = arith.constant 0 : i32
    %0 = arith.cmpi eq, %arg0, %c0_i32 : i32
    %1 = arith.extui %0 : i1 to i32
    %c0_i32_0 = arith.constant 0 : i32
    %2 = arith.cmpi ne, %1, %c0_i32_0 : i32
    scf.if %2 {
      %cst_9 = arith.constant 0.000000e+00 : f32
      %12 = vector.broadcast %cst_9 : f32 to vector<16x128xf32>
      %c0_10 = arith.constant 0 : index
      %c0_11 = arith.constant 0 : index
      %13 = vector.load %arg4[%c0_10, %c0_11] : memref<16x128xf32, #tpu.memory_space<vmem>>, vector<16x128xf32>
      tpu.vector_store %arg4[%c0_10, %c0_11], %12 {strides = array<i32>} : memref<16x128xf32, #tpu.memory_space<vmem>>, vector<16x128xf32>,
    } else {
    }
    %c0 = arith.constant 0 : index
    %c0_1 = arith.constant 0 : index
    %3 = vector.load %arg4[%c0, %c0_1] : memref<16x128xf32, #tpu.memory_space<vmem>>, vector<16x128xf32>
    %c0_2 = arith.constant 0 : index
    %c0_3 = arith.constant 0 : index
    %4 = vector.load %arg1[%c0_2, %c0_3] : memref<16x512xbf16, #tpu.memory_space<vmem>>, vector<16x512xbf16>
    %c0_4 = arith.constant 0 : index
    %c0_5 = arith.constant 0 : index
    %5 = vector.load %arg2[%c0_4, %c0_5] : memref<512x128xbf16, #tpu.memory_space<vmem>>, vector<512x128xbf16>
    %cst = arith.constant dense<0.000000e+00> : vector<16x128xf32>
    %6 = tpu.matmul %4, %5, %cst {dimension_numbers = #tpu.dot_dimension_numbers<[1], [0], [0], [1], [0, 0, 1, 1], [], []>} : vector<16x512xbf16>, vector<512x128xbf16>, vector<16x128xf32> -> vector<16x128xf32>
    %7 = arith.addf %3, %6 : vector<16x128xf32>
    %c0_6 = arith.constant 0 : index
    %c0_7 = arith.constant 0 : index
    %8 = vector.load %arg4[%c0_6, %c0_7] : memref<16x128xf32, #tpu.memory_space<vmem>>, vector<16x128xf32>
    tpu.vector_store %arg4[%c0_6, %c0_7], %7 {strides = array<i32>} : memref<16x128xf32, #tpu.memory_space<vmem>>, vector<16x128xf32>,
    %c1_i32 = arith.constant 1 : i32
    %9 = arith.cmpi eq, %arg0, %c1_i32 : i32
    %10 = arith.extui %9 : i1 to i32
    %c0_i32_8 = arith.constant 0 : i32
    %11 = arith.cmpi ne, %10, %c0_i32_8 : i32
    scf.if %11 {
      %c0_9 = arith.constant 0 : index
      %c0_10 = arith.constant 0 : index
      %12 = vector.load %arg4[%c0_9, %c0_10] : memref<16x128xf32, #tpu.memory_space<vmem>>, vector<16x128xf32>
      %cst_11 = arith.constant 0.000000e+00 : f32
      %13 = vector.broadcast %cst_11 : f32 to vector<16x128xf32>
      %14 = arith.maximumf %12, %13 : vector<16x128xf32>
      %c0_12 = arith.constant 0 : index
      %c0_13 = arith.constant 0 : index
      %15 = vector.load %arg3[%c0_12, %c0_13] : memref<16x128xf32, #tpu.memory_space<vmem>>, vector<16x128xf32>
      tpu.vector_store %arg3[%c0_12, %c0_13], %14 {strides = array<i32>} : memref<16x128xf32, #tpu.memory_space<vmem>>, vector<16x128xf32>,
    } else {
    }
    return
  }
  func.func @transform_0(%arg0: i32) -> (i32, i32) {
    %c0_i32 = arith.constant 0 : i32
    %c0_i32_0 = arith.constant 0 : i32
    return %c0_i32, %arg0 : i32, i32
  }
  func.func @transform_1(%arg0: i32) -> (i32, i32) {
    %c0_i32 = arith.constant 0 : i32
    %c0_i32_0 = arith.constant 0 : i32
    return %arg0, %c0_i32 : i32, i32
  }
  func.func @transform_2(%arg0: i32) -> (i32, i32) {
    %c0_i32 = arith.constant 0 : i32
    %c0_i32_0 = arith.constant 0 : i32
    %c0_i32_1 = arith.constant 0 : i32
    return %c0_i32, %c0_i32_0 : i32, i32
  }
}

</mosaic_0001>

<bundles_post_ra>
// kernel: tpu_custom_call.1
= control target key start
LH: loop header
LB: loop body
LE: loop exit
PB: predicated region body
PF: predicated region fallthrough
CT: control target
= control target key end

     0   :  { %7 = vsyncpa [#allocation4], 0  ;;  %s1226_s0 = inlined_call_operand.hbm [shape: bf16[16,1024], index: 0, kind: input, shape index: {}]   ;;  %s1227_s1 = inlined_call_operand.hbm [shape: bf16[1024,128], index: 1, kind: input, shape index: {}]   ;;  %s1228_s2 = inlined_call_operand.hbm [shape: f32[16,128], index: 2, kind: output, shape index: {}]  }
   0x1   :  { %9 = vsyncpa [#allocation4 + $0x1], 0 }
   0x2   :  { %10 = vsyncpa [#allocation7], 0 }
   0x3   :  { %12 = vsyncpa [#allocation7 + $0x1], 0 }
   0x4   :  { %13 = vsyncpa [#allocation5], 0  ;;  %s1012_s9 = smov 0   ;;  %s1014_s10 = smov 0  }
   0x5   :  { %s1016_s11 = smov 0   ;;  %s1018_s12 = smov 0  }
   0x6 LB: > { %s1031_s13 = sadd.s32 4294967295, %s984_s12   ;;  %s1034_s14 = sadd.s32 1, %s984_s12   ;;  %s984_s12 = sphi %s1018_s12, %s1237_s12   ;;  %s980_s11 = sphi %s1016_s11, %s1236_s11   ;;  %s976_s10 = sphi %s1014_s10, %s1235_s10   ;;  %s972_s9 = sphi %s1012_s9, %s1234_s9  }
   0x7   : > { %s23_s15 = ssub.s32 %s984_s12, %s1034_s14  ;;  %s26_s16 = sadd.s32 1, %s980_s11 }
   0x8   : > { %p24_p0 = scmp.eq.s32.totalorder %s23_s15, 0  ;;  %p33_p1 = scmp.ne.s32.totalorder %s980_s11, %s976_s10 }
   0x9   : > { %p34_p2 = scmp.eq.s32.totalorder %s984_s12, 0  ;;  %p39_p3 = scmp.ne.s32.totalorder %s976_s10, %s972_s9 }
   0xa   : > { %s1044_s17 = scalar_select %p24_p0, %s980_s11, %s26_s16  }
   0xb   : > { %p35_p4 = por %p34_p2, %p33_p1  ;;  %p40_p5 = scmp.eq.s32.totalorder %s1031_s13, 0 }
   0xc   : > { %p774_p6 = scmp.lt.s32.totalorder %s984_s12, 2  ;;  %s1053_s19 = sand.u32 1, %s980_s11  }
   0xd   : > { %p1048_p7 = por %p40_p5, %p39_p3  ;;  %s662_s20 = sshll.u32 %s1053_s19, 5 }
   0xe   : > { %s713_s21 = sshll.u32 %s984_s12, 8  ;;  %s114_s25 = scalar_lea.vmem [#allocation3], %s662_s20 }
   0xf   : > { %s1230_s18 = scalar_select %p1048_p7, 1, 0 }
  0x10   : > { %s1060_s24 = scalar_lea.hbm %s1226_s0, %s713_s21  ;;  %s121_s26 = sshll.u32 %s114_s25, 4  ;;  %s1062_s26 = int_to_ptr.vmem [resolvable:$true] %s121_s26 }
  0x11   : > { %p1064_p8 = pnand %p774_p6, %p35_p4  ;;  %s111_s28 = scalar_lea.sflag [#allocation4], %s1053_s19 }
  0x12   : > { %s856_s29 = scalar_lea.hbm %s1060_s24, 512  ;;  %s861_s4 = scalar_lea.hbm %s1226_s0, 1024 }
  0x13   : > { %p857_p9 = scmp.ne.s32.totalorder %s1060_s24, %s856_s29  ;;  %p858_p10 = pneg %p1064_p8 }
  0x14   : > { %p862_p13 = scmp.lt.u32.totalorder %s1060_s24, %s1226_s0  ;;  %p863_p0 = scmp.lt.u32.totalorder %s861_s4, %s856_s29 }
  0x15   : > { %p859_p11 = pnand %p858_p10, %p857_p9  ;;  %p865_p2 = scmp.lt.u32.totalorder %s856_s29, %s1060_s24 }
  0x16   : > { %p864_p1 = por %p863_p0, %p862_p13 }
  0x17   : > { %p860_p12 = pneg %p859_p11 }
  0x18   : > { %p866_p3 = por %p865_p2, %p864_p1 }
  0x1a   : > { %p867_p4 = pnand %p866_p3, %p860_p12 }
  0x1c   : > { %870 = shalt.err (!%p867_p4)
}
  0x1d   : > { %s871_s7 = scalar_lea.vmem %s1062_s26, 512  ;;  %s986_s8 = smov [#allocation3]  }
  0x1e   : > { %p872_p5 = scmp.ne.s32.totalorder %s1062_s26, %s871_s7  ;;  %s876_s9 = sshll.u32 %s986_s8, 4  ;;  %s877_s9 = int_to_ptr.vmem [resolvable:$false] %s876_s9 }
  0x1f   : > { %s878_s15 = scalar_lea.vmem %s877_s9, 1024  ;;  %p879_p11 = scmp.lt.s32.totalorder %s1062_s26, %s877_s9 }
  0x20   : > { %p874_p6 = pnand %p872_p5, %p858_p10  ;;  %p880_p13 = scmp.lt.s32.totalorder %s878_s15, %s871_s7 }
  0x22   : > { %p875_p9 = pneg %p874_p6  ;;  %p881_p0 = por %p880_p13, %p879_p11 }
  0x24   : > { %p882_p1 = pnand %p881_p0, %p875_p9 }
  0x26   : > { %885 = shalt.err (!%p882_p1)
}
  0x27   : > { %s987_s16 = smov 512   ;;  %s988_s20 = smov 256  }
  0x28   : > { %s989_s21 = smov 16   ;;  %p668_p12 = scmp.ge.s32.totalorder %s984_s12, 1 }
  0x29   : > { %770 = dma.hbm_to_vmem [thread:$0]  (!%p1064_p8), %s1060_s24, 512, %s1062_s26, %s111_s28, %s987_s16, %s988_s20, %s989_s21  }
  0x2a   : > { %p150_p2 = scmp.lt.s32.totalorder %s984_s12, 3  ;;  %s665_s22 = sshll.u32 %s1053_s19, 8 }
  0x2b   : > { %s714_s25 = sshll.u32 %s984_s12, 12  ;;  %s135_s29 = scalar_lea.vmem [#allocation6], %s665_s22 }
  0x2c   : > { %p1099_p3 = pnand %p668_p12, %p150_p2  ;;  %s142_s30 = sshll.u32 %s135_s29, 4  ;;  %s1109_s30 = int_to_ptr.vmem [resolvable:$true] %s142_s30 }
  0x2d   : > { %s1107_s5 = scalar_lea.hbm %s1227_s1, %s714_s25  ;;  %s132_s24 = scalar_lea.sflag [#allocation7], %s1053_s19 }
  0x2e   : > { %s886_s26 = scalar_lea.hbm %s1107_s5, 4096  ;;  %s891_s6 = scalar_lea.hbm %s1227_s1, 8192 }
  0x2f   : > { %p887_p4 = scmp.ne.s32.totalorder %s1107_s5, %s886_s26  ;;  %p892_p9 = scmp.lt.u32.totalorder %s1107_s5, %s1227_s1 }
  0x30   : > { %p893_p11 = scmp.lt.u32.totalorder %s891_s6, %s886_s26  ;;  %p895_p0 = scmp.lt.u32.totalorder %s886_s26, %s1107_s5 }
  0x31   : > { %p889_p5 = pnand %p887_p4, %p858_p10 }
  0x32   : > { %p894_p13 = por %p893_p11, %p892_p9 }
  0x33   : > { %p890_p6 = pneg %p889_p5 }
  0x34   : > { %p896_p1 = por %p895_p0, %p894_p13 }
  0x36   : > { %p897_p12 = pnand %p896_p1, %p890_p6 }
  0x38   : > { %900 = shalt.err (!%p897_p12)
}
  0x39   : > { %s901_s9 = scalar_lea.vmem %s1109_s30, 4096  ;;  %s990_s15 = smov [#allocation6]  }
  0x3a   : > { %p902_p2 = scmp.ne.s32.totalorder %s1109_s30, %s901_s9  ;;  %s906_s16 = sshll.u32 %s990_s15, 4  ;;  %s907_s16 = int_to_ptr.vmem [resolvable:$false] %s906_s16 }
  0x3b   : > { %s908_s20 = scalar_lea.vmem %s907_s16, 8192  ;;  %p909_p7 = scmp.lt.s32.totalorder %s1109_s30, %s907_s16 }
  0x3c   : > { %p904_p4 = pnand %p902_p2, %p858_p10  ;;  %p910_p9 = scmp.lt.s32.totalorder %s908_s20, %s901_s9 }
  0x3e   : > { %p905_p5 = pneg %p904_p4  ;;  %p911_p11 = por %p910_p9, %p909_p7 }
  0x40   : > { %p912_p13 = pnand %p911_p11, %p905_p5 }
  0x42   : > { %915 = shalt.err (!%p912_p13)
}
  0x43   : > { %s991_s21 = smov 64   ;;  %s992_s22 = smov 4  }
  0x44   : > { %773 = dma.hbm_to_vmem [thread:$0]  (!%p1064_p8), %s1107_s5, 4096, %s1109_s30, %s132_s24, %s991_s21, %s991_s21, %s992_s22  }
  0x45   : > { %154 = sbr.rel (%p1099_p3) target bundleno = 382 (0x17e), region = 28  ;;  %s156_s25 = sand.u32 (!%p1099_p3), 1, %s976_s10  }
  0x46   : > { %s669_s29 = sshll.u32 (!%p1099_p3), %s156_s25, 5  ;;  %s157_s3 = scalar_lea.sflag (!%p1099_p3), [#allocation4], %s156_s25 }
  0x47   : > { %s1140_s4 = scalar_lea.vmem (!%p1099_p3), [#allocation3], %s669_s29  ;;  %p1233_p7 = scmp.ne.s32.totalorder (!%p1099_p3), %s1230_s18, 0 }
  0x4c   : > { %959 = dma.done.wait (%p1233_p7), %s157_s3, 512  }
  0x4d   : > { %961 = vsyncadd (%p1233_p7), %s157_s3, 4294966784  ;;  %s670_s26 = sshll.u32 %s156_s25, 8  ;;  %s166_s27 = scalar_lea.sflag [#allocation7], %s156_s25 }
  0x4e   : > { %s1146_s19 = scalar_lea.vmem [#allocation6], %s670_s26 }
  0x4f   : > { %963 = dma.done.wait (%p1233_p7), %s166_s27, 4096  }
  0x50   : > { %965 = vsyncadd (%p1233_p7), %s166_s27, 4294963200  ;;  %p671_p8 = scmp.ne.s32.totalorder %s1031_s13, 0 }
  0x51   : > { %v993_v0 = vmov (!%p671_p8), 0.0  }
  0x52   : > { %196 = sbr.rel (%p671_p8) target bundleno = 89 (0x59), region = 40  ;;  %197 = vst [vmem:[#allocation2] sm:$0xff] (!%p671_p8), %v993_v0  ;;  %198 = vst [vmem:[#allocation2 + $0x8] sm:$0xff] (!%p671_p8), %v993_v0 }
  0x59 PF: > { %v818_v1 = vld [vmem:[%s1146_s19 + $0x40] sm:$0xff]   ;;  %v822_v5 = vld [vmem:[%s1146_s19 + $0x48] sm:$0xff]   ;;  %v826_v9 = vld [vmem:[%s1146_s19 + $0x50] sm:$0xff]   ;;  %p708_p10 = scmp.ne.s32.totalorder %s1031_s13, 1 }
  0x5a   : > { %v819_v2 = vld [vmem:[%s1146_s19 + $0xc0] sm:$0xff]   ;;  %715 = vmatprep.subr.bf16.mxu0 %v818_v1  ;;  %v823_v6 = vld [vmem:[%s1146_s19 + $0xc8] sm:$0xff]   ;;  %v827_v10 = vld [vmem:[%s1146_s19 + $0xd0] sm:$0xff]  }
  0x5b   : > { %v820_v3 = vld [vmem:[%s1146_s19] sm:$0xff]   ;;  %737 = vmatprep.subr.bf16.mxu1 %v819_v2  ;;  %v824_v7 = vld [vmem:[%s1146_s19 + $0x8] sm:$0xff]   ;;  %v828_v11 = vld [vmem:[%s1146_s19 + $0x10] sm:$0xff]  }
  0x5c   : > { %v821_v4 = vld [vmem:[%s1146_s19 + $0x80] sm:$0xff]   ;;  %716 = vmatpush3.bf16.msra.mxu0 %v820_v3  ;;  %v825_v8 = vld [vmem:[%s1146_s19 + $0x88] sm:$0xff]   ;;  %v829_v12 = vld [vmem:[%s1146_s19 + $0x90] sm:$0xff]  }
  0x5d   : > { %738 = vmatpush3.bf16.msra.mxu1 %v821_v4  ;;  %717 = vmatprep.subr.bf16.mxu0 %v822_v5  ;;  %v830_v13 = vld [vmem:[%s1146_s19 + $0x58] sm:$0xff]   ;;  %v834_v17 = vld [vmem:[%s1146_s19 + $0x60] sm:$0xff]   ;;  %v838_v21 = vld [vmem:[%s1146_s19 + $0x68] sm:$0xff]  }
  0x5e   : > { %739 = vmatprep.subr.bf16.mxu1 %v823_v6  ;;  %v831_v14 = vld [vmem:[%s1146_s19 + $0xd8] sm:$0xff]   ;;  %v835_v18 = vld [vmem:[%s1146_s19 + $0xe0] sm:$0xff]   ;;  %v839_v22 = vld [vmem:[%s1146_s19 + $0xe8] sm:$0xff]  }
  0x5f   : > { %v832_v15 = vld [vmem:[%s1146_s19 + $0x18] sm:$0xff]   ;;  %v836_v19 = vld [vmem:[%s1146_s19 + $0x20] sm:$0xff]   ;;  %v840_v23 = vld [vmem:[%s1146_s19 + $0x28] sm:$0xff]  }
  0x60   : > { %718 = vmatpush3.bf16.msra.mxu0 %v824_v7  ;;  %v833_v16 = vld [vmem:[%s1146_s19 + $0x98] sm:$0xff]   ;;  %v837_v20 = vld [vmem:[%s1146_s19 + $0xa0] sm:$0xff]   ;;  %v841_v24 = vld [vmem:[%s1146_s19 + $0xa8] sm:$0xff]  }
  0x61   : > { %740 = vmatpush3.bf16.msra.mxu1 %v825_v8  ;;  %719 = vmatprep.subr.bf16.mxu0 %v826_v9  ;;  %v842_v25 = vld [vmem:[%s1146_s19 + $0x70] sm:$0xff]   ;;  %v846_v29 = vld [vmem:[%s1146_s19 + $0x78] sm:$0xff]  }
  0x62   : > { %741 = vmatprep.subr.bf16.mxu1 %v827_v10  ;;  %v843_v26 = vld [vmem:[%s1146_s19 + $0xf0] sm:$0xff]   ;;  %v847_v30 = vld [vmem:[%s1146_s19 + $0xf8] sm:$0xff]  }
  0x63   : > { %v844_v27 = vld [vmem:[%s1146_s19 + $0x30] sm:$0xff]   ;;  %v848_v31 = vld [vmem:[%s1146_s19 + $0x38] sm:$0xff]  }
  0x64   : > { %720 = vmatpush3.bf16.msra.mxu0 %v828_v11  ;;  %v845_v28 = vld [vmem:[%s1146_s19 + $0xb0] sm:$0xff]   ;;  %v849_v32 = vld [vmem:[%s1146_s19 + $0xb8] sm:$0xff]  }
  0x65   : > { %742 = vmatpush3.bf16.msra.mxu1 %v829_v12  ;;  %721 = vmatprep.subr.bf16.mxu0 %v830_v13  ;;  %v850_v33 = vld [vmem:[%s1140_s4] ss:$16 sps:$4 sm:$0xff]   ;;  %v852_v34 = vld [vmem:[%s1140_s4 + $0x4] ss:$16 sps:$4 sm:$0xff]   ;;  %v853_v35 = vld [vmem:[%s1140_s4 + $0x8] ss:$16 sps:$4 sm:$0xff]  }
  0x66   : > { %743 = vmatprep.subr.bf16.mxu1 %v831_v14  ;;  %v855_v36 = vld [vmem:[%s1140_s4 + $0xc] ss:$16 sps:$4 sm:$0xff]   ;;  %513 = vmatprep.mubr.bf16.mxu0 %v852_v34  ;;  %v199_v46 = vld [vmem:[#allocation2] sm:$0xff] }
  0x67   : > { %554 = vmatprep.mubr.bf16.mxu1 %v855_v36  ;;  %v200_v51 = vld [vmem:[#allocation2 + $0x8] sm:$0xff] }
  0x68   : > { %722 = vmatpush3.bf16.msra.mxu0 %v832_v15 }
  0x69   : > { %744 = vmatpush3.bf16.msra.mxu1 %v833_v16  ;;  %723 = vmatprep.subr.bf16.mxu0 %v834_v17 }
  0x6a   : > { %745 = vmatprep.subr.bf16.mxu1 %v835_v18 }
  0x6c   : > { %724 = vmatpush3.bf16.msra.mxu0 %v836_v19 }
  0x6d   : > { %746 = vmatpush3.bf16.msra.mxu1 %v837_v20  ;;  %725 = vmatprep.subr.bf16.mxu0 %v838_v21 }
  0x6e   : > { %747 = vmatprep.subr.bf16.mxu1 %v839_v22 }
  0x70   : > { %726 = vmatpush3.bf16.msra.mxu0 %v840_v23 }
  0x71   : > { %748 = vmatpush3.bf16.msra.mxu1 %v841_v24  ;;  %727 = vmatprep.subr.bf16.mxu0 %v842_v25 }
  0x72   : > { %749 = vmatprep.subr.bf16.mxu1 %v843_v26 }
  0x74   : > { %728 = vmatpush3.bf16.msra.mxu0 %v844_v27 }
  0x75   : > { %750 = vmatpush3.bf16.msra.mxu1 %v845_v28  ;;  %729 = vmatprep.subr.bf16.mxu0 %v846_v29 }
  0x76   : > { %751 = vmatprep.subr.bf16.mxu1 %v847_v30 }
  0x78   : > { %730 = vmatpush3.bf16.msra.mxu0 %v848_v31 }
  0x79   : > { %752 = vmatpush3.bf16.msra.mxu1 %v849_v32 }
  0x7b   : > { %514 = vmatmul.mubr.bf16.vlgmr.msra.gmra.mrb[0].mxu0 %v850_v33 }
  0x7c   : > { %555 = vmatmul.mubr.bf16.vlgmr.msra.gmra.mrb[0].mxu1 %v853_v35 }
 0x14e   : > { %v731_v37 = vpop.f32.mrb[0].mxu0 }
 0x14f   : > { %v753_v38 = vpop.f32.mrb[0].mxu1  ;;  %v732_v39 = vpop.f32.mrb[1].mxu0 }
 0x150   : > { %v733_v40 = vadd.f32 %v732_v39, %v731_v37  ;;  %v754_v41 = vpop.f32.mrb[1].mxu1  ;;  %v734_v42 = vpop.f32.mrb[2].mxu0 }
 0x151   : > { %v755_v43 = vadd.f32 %v754_v41, %v753_v38  ;;  %v756_v44 = vpop.f32.mrb[2].mxu1  ;;  %v735_v45 = vpop.f32.mrb[3].mxu0 }
 0x152   : > { %v736_v47 = vadd.f32 %v735_v45, %v734_v42  ;;  %v757_v48 = vpop.f32.mrb[3].mxu1 }
 0x153   : > { %v557_v49 = vadd.f32 %v755_v43, %v733_v40  ;;  %v758_v50 = vadd.f32 %v757_v48, %v756_v44  ;;  %570 = sbr.rel (%p708_p10) target bundleno = 356 (0x164), region = 44 }
 0x155   : > { %v563_v52 = vadd.f32 %v557_v49, %v199_v46  ;;  %v560_v53 = vadd.f32 %v758_v50, %v736_v47 }
 0x157   : > { %565 = vst [vmem:[#allocation2] sm:$0xff] %v563_v52  ;;  %v564_v54 = vadd.f32 %v560_v53, %v200_v51 }
 0x159   : > { %566 = vst [vmem:[#allocation2 + $0x8] sm:$0xff] %v564_v54 }
 0x15e   : > { %v571_v55 = vld [vmem:[#allocation2] sm:$0xff] }
 0x15f   : > { %v573_v57 = vmax.f32 %v571_v55, 0.0 }
 0x160   : > { %v572_v56 = vld [vmem:[#allocation2 + $0x8] sm:$0xff] }
 0x161   : > { %v574_v58 = vmax.f32 %v572_v56, 0.0  ;;  %575 = vst [vmem:[#allocation8] sm:$0xff] %v573_v57 }
 0x163   : > { %576 = vst [vmem:[#allocation8 + $0x8] sm:$0xff] %v574_v58 }
 0x164 PF: > { %p775_p3 = scmp.eq.s32.totalorder %s1031_s13, 1  ;;  %s994_s18 = smov [#allocation8]  }
 0x165   : > { %s583_s23 = sshll.u32 %s994_s18, 4  ;;  %s584_s23 = int_to_ptr.vmem [resolvable:$true] %s583_s23 }
 0x166   : > { %s916_s30 = scalar_lea.vmem %s584_s23, 256  ;;  %p923_p12 = scmp.lt.s32.totalorder %s584_s23, %s584_s23 }
 0x167   : > { %p917_p6 = scmp.ne.s32.totalorder %s584_s23, %s916_s30  ;;  %p924_p2 = scmp.lt.s32.totalorder %s916_s30, %s916_s30 }
 0x169   : > { %p918_p0 = pnand %p917_p6, %p775_p3  ;;  %p925_p4 = por %p924_p2, %p923_p12 }
 0x16b   : > { %p919_p1 = pneg %p918_p0 }
 0x16d   : > { %p926_p5 = pnand %p925_p4, %p919_p1 }
 0x16f   : > { %929 = shalt.err (!%p926_p5)
}
 0x170   : > { %s930_s12 = scalar_lea.hbm %s1228_s2, 256 }
 0x171   : > { %p931_p9 = scmp.ne.s32.totalorder %s1228_s2, %s930_s12  ;;  %p936_p7 = scmp.lt.u32.totalorder %s930_s12, %s1228_s2 }
 0x173   : > { %p932_p11 = pnand %p931_p9, %p775_p3 }
 0x175   : > { %p933_p13 = pneg %p932_p11 }
 0x177   : > { %p938_p8 = pnand %p936_p7, %p933_p13 }
 0x179   : > { %941 = shalt.err (!%p938_p8)
}
 0x17a   : > { %s995_s9 = smov 128   ;;  %s996_s15 = smov 8  }
 0x17b   : > { %764 = dma.vmem_to_hbm [thread:$0]  (%p775_p3), %s584_s23, 256, %s1228_s2, [#allocation5], %s995_s9, %s995_s9, %s996_s15  }
 0x17c   : > { %967 = dma.done.wait (%p775_p3), [#allocation5], 256  }
 0x17d   : > { %969 = vsyncadd (%p775_p3), [#allocation5], 4294967040 }
 0x17e PF: > { %p16_p10 = scmp.ge.s32.totalorder %s1034_s14, 4   ;;  %s1234_s9 = smov %s976_s10 }
 0x17f   : > { %s1235_s10 = smov %s980_s11  ;;  %s1236_s11 = smov %s1044_s17 }
 0x180   : > { %s1237_s12 = smov %s1034_s14  ;;  %18 = sbr.rel (!%p16_p10) target bundleno = 6 (0x6), region = 86 }
 0x187   :  { %599 = vsyncpa [#allocation4], 1 }
 0x188   :  { %601 = vsyncpa [#allocation4 + $0x1], 1 }
 0x189   :  { %602 = vsyncpa [#allocation7], 1 }
 0x18a   :  { %604 = vsyncpa [#allocation7 + $0x1], 1 }
 0x18b   :  { %605 = vsyncpa [#allocation5], 1 }
 0x18c   :  { %607 = vsyncpa [#allocation5 + $0x1], 1 }

</bundles_post_ra>
